<compile_context>
chip_gen: v7x
topology: tpu7x:2x2x1
jax: 0.10.0
libtpu: 0.0.40
codegen_flags: <defaults>
</compile_context>

<pallas_src>
import functools

import jax
import jax.numpy as jnp
from jax.experimental import pallas as pl
from jax.experimental.pallas import tpu as pltpu


def mlp_kernel(x_ref, w1_ref, b1_ref, w2_ref, b2_ref, w34_ref, b34_ref, o_ref):
    # One (TB, 20) batch tile; all weights fully resident in VMEM.
    x = x_ref[...]

    # Linear(20, 30) + ReLU
    h1 = jnp.dot(x, w1_ref[...], preferred_element_type=jnp.float32) + b1_ref[...]
    h1 = jnp.maximum(h1, 0.0)

    # Linear(30, 10) + ReLU
    h2 = jnp.dot(h1, w2_ref[...], preferred_element_type=jnp.float32) + b2_ref[...]
    h2 = jnp.maximum(h2, 0.0)

    # Fused Linear(10, 10) -> Linear(10, 2)  (no nonlinearity in between)
    out = jnp.dot(h2, w34_ref[...], preferred_element_type=jnp.float32) + b34_ref[...]

    o_ref[...] = out.astype(o_ref.dtype)


@functools.partial(jax.jit, static_argnames=("block_rows",))
def mymodel_forward(x, params, *, block_rows=1024):
    """x: (B, 20) float32 -> (B, 2) float32."""
    w1, b1, w2, b2, w3, b3, w4, b4 = params

    # Fold the two bias-only linears: y = (h @ w3 + b3) @ w4 + b4
    #                                   =  h @ (w3 @ w4) + (b3 @ w4 + b4)
    w34 = jnp.dot(w3, w4, preferred_element_type=jnp.float32)
    b34 = jnp.dot(b3, w4, preferred_element_type=jnp.float32) + b4

    B, F = x.shape
    # Batch tile: full batch if small, otherwise 1024 rows (multiple of 8,
    # comfortably double-bufferable even within v7x's 64 MiB VMEM).
    TB = B if B <= block_rows else block_rows
    grid = (pl.cdiv(B, TB),)

    def batch_spec(ncols):
        return pl.BlockSpec((TB, ncols), lambda i: (i, 0))

    def resident_spec(shape):
        # Full-array block, same block index every grid step -> stays in VMEM.
        return pl.BlockSpec(shape, lambda i: (0, 0))

    in_specs = [
        batch_spec(F),                 # x       (TB, 20) per step
        resident_spec(w1.shape),       # w1      (20, 30)
        resident_spec(b1.shape),       # b1      (1, 30)
        resident_spec(w2.shape),       # w2      (30, 10)
        resident_spec(b2.shape),       # b2      (1, 10)
        resident_spec(w34.shape),      # w34     (10, 2)
        resident_spec(b34.shape),      # b34     (1, 2)
    ]

    flops = 2 * B * (20 * 30 + 30 * 10 + 10 * 2)
    bytes_accessed = (x.size + B * 2 + w1.size + b1.size + w2.size + b2.size
                      + w34.size + b34.size) * 4

    return pl.pallas_call(
        mlp_kernel,
        out_shape=jax.ShapeDtypeStruct((B, 2), jnp.float32),
        grid=grid,
        in_specs=in_specs,
        out_specs=pl.BlockSpec((TB, 2), lambda i: (i, 0)),
        compiler_params=pltpu.CompilerParams(
            dimension_semantics=("parallel",)),
        cost_estimate=pl.CostEstimate(
            flops=flops, transcendentals=0, bytes_accessed=bytes_accessed),
    )(x, w1, b1, w2, b2, w34, b34)


def init_params():
    """Deterministic parameter init (PyTorch-Linear-like uniform fan-in)."""
    key = jax.random.PRNGKey(0)
    dims = [(20, 30), (30, 10), (10, 10), (10, 2)]
    params = []
    for i, (fan_in, fan_out) in enumerate(dims):
        kw, kb = jax.random.split(jax.random.fold_in(key, i + 1))
        bound = 1.0 / jnp.sqrt(fan_in)
        w = jax.random.uniform(kw, (fan_in, fan_out), jnp.float32, -bound, bound)
        # biases kept 2D (1, fan_out) for clean TPU layout / broadcasting
        b = jax.random.uniform(kb, (1, fan_out), jnp.float32, -bound, bound)
        params += [w, b]
    return tuple(params)


def reference_forward(x, params):
    w1, b1, w2, b2, w3, b3, w4, b4 = params
    h = jnp.maximum(x @ w1 + b1, 0.0)
    h = jnp.maximum(h @ w2 + b2, 0.0)
    h = h @ w3 + b3
    return h @ w4 + b4


if __name__ == "__main__":
    key = jax.random.PRNGKey(0)
    B = 8
    x = jax.random.normal(key, (B, 20), jnp.float32)

    params = init_params()

    out = mymodel_forward(x, params)
    out = jax.block_until_ready(out)

    ref = reference_forward(x, params)
    assert out.shape == (B, 2), out.shape
    assert jnp.allclose(out, ref, atol=1e-5, rtol=1e-5), "mismatch vs reference"

    # Also exercise the multi-tile (pipelined) path with a batch that is not a
    # multiple of the tile size, still small enough to run fast anywhere.
    B2 = 2056
    x2 = jax.random.normal(jax.random.fold_in(key, 7), (B2, 20), jnp.float32)
    out2 = jax.block_until_ready(mymodel_forward(x2, params))
    ref2 = reference_forward(x2, params)
    assert out2.shape == (B2, 2), out2.shape
    assert jnp.allclose(out2, ref2, atol=1e-5, rtol=1e-5), "mismatch (tiled)"

    print("KERNEL_OK")
</pallas_src>

<mosaic_0001>
module attributes {stable_mosaic.version = 11 : i64} {
  func.func @mlp_kernel(%arg0: i32, %arg1: memref<8x20xf32, #tpu.memory_space<vmem>>, %arg2: memref<20x30xf32, #tpu.memory_space<vmem>>, %arg3: memref<1x30xf32, #tpu.memory_space<vmem>>, %arg4: memref<30x10xf32, #tpu.memory_space<vmem>>, %arg5: memref<1x10xf32, #tpu.memory_space<vmem>>, %arg6: memref<10x2xf32, #tpu.memory_space<vmem>>, %arg7: memref<1x2xf32, #tpu.memory_space<vmem>>, %arg8: memref<8x2xf32, #tpu.memory_space<vmem>>) attributes {dimension_semantics = [#tpu.dimension_semantics<parallel>], iteration_bounds = array<i64: 1>, scalar_prefetch = 0 : i64, scratch_operands = 0 : i64, tpu.core_type = #tpu.core_type<tc>, window_params = [{transform_indices = @transform_0, window_bounds = array<i64: 8, 20>}, {pipeline_mode = #tpu.pipeline_mode<synchronous>, transform_indices = @transform_1, window_bounds = array<i64: 20, 30>}, {pipeline_mode = #tpu.pipeline_mode<synchronous>, transform_indices = @transform_2, window_bounds = array<i64: 1, 30>}, {pipeline_mode = #tpu.pipeline_mode<synchronous>, transform_indices = @transform_3, window_bounds = array<i64: 30, 10>}, {pipeline_mode = #tpu.pipeline_mode<synchronous>, transform_indices = @transform_4, window_bounds = array<i64: 1, 10>}, {pipeline_mode = #tpu.pipeline_mode<synchronous>, transform_indices = @transform_5, window_bounds = array<i64: 10, 2>}, {pipeline_mode = #tpu.pipeline_mode<synchronous>, transform_indices = @transform_6, window_bounds = array<i64: 1, 2>}, {transform_indices = @transform_7, window_bounds = array<i64: 8, 2>}]} {
    %c0 = arith.constant 0 : index
    %c0_0 = arith.constant 0 : index
    %0 = vector.load %arg1[%c0, %c0_0] : memref<8x20xf32, #tpu.memory_space<vmem>>, vector<8x20xf32>
    %c0_1 = arith.constant 0 : index
    %c0_2 = arith.constant 0 : index
    %1 = vector.load %arg2[%c0_1, %c0_2] : memref<20x30xf32, #tpu.memory_space<vmem>>, vector<20x30xf32>
    %cst = arith.constant dense<0.000000e+00> : vector<8x30xf32>
    %2 = tpu.matmul %0, %1, %cst {dimension_numbers = #tpu.dot_dimension_numbers<[1], [0], [0], [1], [0, 0, 1, 1], [], []>} : vector<8x20xf32>, vector<20x30xf32>, vector<8x30xf32> -> vector<8x30xf32>
    %c0_3 = arith.constant 0 : index
    %c0_4 = arith.constant 0 : index
    %3 = vector.load %arg3[%c0_3, %c0_4] : memref<1x30xf32, #tpu.memory_space<vmem>>, vector<1x30xf32>
    %4 = vector.broadcast %3 : vector<1x30xf32> to vector<8x30xf32>
    %5 = arith.addf %2, %4 : vector<8x30xf32>
    %cst_5 = arith.constant 0.000000e+00 : f32
    %6 = vector.broadcast %cst_5 : f32 to vector<8x30xf32>
    %7 = arith.maximumf %5, %6 : vector<8x30xf32>
    %c0_6 = arith.constant 0 : index
    %c0_7 = arith.constant 0 : index
    %8 = vector.load %arg4[%c0_6, %c0_7] : memref<30x10xf32, #tpu.memory_space<vmem>>, vector<30x10xf32>
    %cst_8 = arith.constant dense<0.000000e+00> : vector<8x10xf32>
    %9 = tpu.matmul %7, %8, %cst_8 {dimension_numbers = #tpu.dot_dimension_numbers<[1], [0], [0], [1], [0, 0, 1, 1], [], []>} : vector<8x30xf32>, vector<30x10xf32>, vector<8x10xf32> -> vector<8x10xf32>
    %c0_9 = arith.constant 0 : index
    %c0_10 = arith.constant 0 : index
    %10 = vector.load %arg5[%c0_9, %c0_10] : memref<1x10xf32, #tpu.memory_space<vmem>>, vector<1x10xf32>
    %11 = vector.broadcast %10 : vector<1x10xf32> to vector<8x10xf32>
    %12 = arith.addf %9, %11 : vector<8x10xf32>
    %cst_11 = arith.constant 0.000000e+00 : f32
    %13 = vector.broadcast %cst_11 : f32 to vector<8x10xf32>
    %14 = arith.maximumf %12, %13 : vector<8x10xf32>
    %c0_12 = arith.constant 0 : index
    %c0_13 = arith.constant 0 : index
    %15 = vector.load %arg6[%c0_12, %c0_13] : memref<10x2xf32, #tpu.memory_space<vmem>>, vector<10x2xf32>
    %cst_14 = arith.constant dense<0.000000e+00> : vector<8x2xf32>
    %16 = tpu.matmul %14, %15, %cst_14 {dimension_numbers = #tpu.dot_dimension_numbers<[1], [0], [0], [1], [0, 0, 1, 1], [], []>} : vector<8x10xf32>, vector<10x2xf32>, vector<8x2xf32> -> vector<8x2xf32>
    %c0_15 = arith.constant 0 : index
    %c0_16 = arith.constant 0 : index
    %17 = vector.load %arg7[%c0_15, %c0_16] : memref<1x2xf32, #tpu.memory_space<vmem>>, vector<1x2xf32>
    %18 = vector.broadcast %17 : vector<1x2xf32> to vector<8x2xf32>
    %19 = arith.addf %16, %18 : vector<8x2xf32>
    %c0_17 = arith.constant 0 : index
    %c0_18 = arith.constant 0 : index
    %20 = vector.load %arg8[%c0_17, %c0_18] : memref<8x2xf32, #tpu.memory_space<vmem>>, vector<8x2xf32>
    tpu.vector_store %arg8[%c0_17, %c0_18], %19 {strides = array<i32>} : memref<8x2xf32, #tpu.memory_space<vmem>>, vector<8x2xf32>,
    return
  }
  func.func @transform_0(%arg0: i32) -> (i32, i32) {
    %c0_i32 = arith.constant 0 : i32
    %c0_i32_0 = arith.constant 0 : i32
    return %arg0, %c0_i32 : i32, i32
  }
  func.func @transform_1(%arg0: i32) -> (i32, i32) {
    %c0_i32 = arith.constant 0 : i32
    %c0_i32_0 = arith.constant 0 : i32
    %c0_i32_1 = arith.constant 0 : i32
    return %c0_i32, %c0_i32_0 : i32, i32
  }
  func.func @transform_2(%arg0: i32) -> (i32, i32) {
    %c0_i32 = arith.constant 0 : i32
    %c0_i32_0 = arith.constant 0 : i32
    %c0_i32_1 = arith.constant 0 : i32
    return %c0_i32, %c0_i32_0 : i32, i32
  }
  func.func @transform_3(%arg0: i32) -> (i32, i32) {
    %c0_i32 = arith.constant 0 : i32
    %c0_i32_0 = arith.constant 0 : i32
    %c0_i32_1 = arith.constant 0 : i32
    return %c0_i32, %c0_i32_0 : i32, i32
  }
  func.func @transform_4(%arg0: i32) -> (i32, i32) {
    %c0_i32 = arith.constant 0 : i32
    %c0_i32_0 = arith.constant 0 : i32
    %c0_i32_1 = arith.constant 0 : i32
    return %c0_i32, %c0_i32_0 : i32, i32
  }
  func.func @transform_5(%arg0: i32) -> (i32, i32) {
    %c0_i32 = arith.constant 0 : i32
    %c0_i32_0 = arith.constant 0 : i32
    %c0_i32_1 = arith.constant 0 : i32
    return %c0_i32, %c0_i32_0 : i32, i32
  }
  func.func @transform_6(%arg0: i32) -> (i32, i32) {
    %c0_i32 = arith.constant 0 : i32
    %c0_i32_0 = arith.constant 0 : i32
    %c0_i32_1 = arith.constant 0 : i32
    return %c0_i32, %c0_i32_0 : i32, i32
  }
  func.func @transform_7(%arg0: i32) -> (i32, i32) {
    %c0_i32 = arith.constant 0 : i32
    %c0_i32_0 = arith.constant 0 : i32
    return %arg0, %c0_i32 : i32, i32
  }
}

</mosaic_0001>

<bundles_post_ra>
// kernel: mymodel_forward.1
= control target key start
LH: loop header
LB: loop body
LE: loop exit
PB: predicated region body
PF: predicated region fallthrough
CT: control target
= control target key end

     0   :  { %v365_v0 = vmov 0.0|0.0   ;;  %vm366_vm0 = vmmov 0   ;;  %v367_v3 = vmov 0.0   ;;  %vm41_vm1 = vcmask 1043456   ;;  %s454_s1 = inlined_call_operand.vmem [shape: f32[20,30], index: 1, kind: input, shape index: {}]   ;;  %s455_s3 = inlined_call_operand.vmem [shape: f32[30,10], index: 3, kind: input, shape index: {}]   ;;  %s456_s0 = inlined_call_operand.vmem [shape: f32[8,20], index: 0, kind: input, shape index: {}]   ;;  %s457_s2 = inlined_call_operand.vmem [shape: f32[1,30], index: 2, kind: input, shape index: {}]   ;;  %s458_s5 = inlined_call_operand.vmem [shape: f32[10,2], index: 5, kind: input, shape index: {}]   ;;  %s459_s4 = inlined_call_operand.vmem [shape: f32[1,10], index: 4, kind: input, shape index: {}]   ;;  %s460_s6 = inlined_call_operand.vmem [shape: f32[1,2], index: 6, kind: input, shape index: {}]   ;;  %s461_s7 = inlined_call_operand.vmem [shape: f32[8,2], index: 7, kind: output, shape index: {}]  }
   0x1   :  { %347 = vmatprep.subr.bf16.mxu0 %v365_v0  ;;  %v27_v1 = vld [vmem:[%s454_s1] sm:$0xff]  ;;  %v28_v2 = vld [vmem:[%s454_s1 + $0x8] sm:$0xff]  ;;  %326 = vmatprep.mubr.msk.f32.mxu0 %vm366_vm0, %v367_v3  ;;  %v29_v8 = vld [vmem:[%s454_s1 + $0x10] sm:$0xf]  ;;  %vm37_vm2 = vcmask 162816   ;;  %vm131_vm3 = vcmask 1045504  }
   0x2   :  { %v348_v4 = vpack.c.bf16 %v28_v2, %v27_v1  ;;  %350 = vmatprep.subr.bf16.mxu1 %v365_v0  ;;  %v116_v5 = vld [vmem:[%s455_s3] sm:$0xff]  ;;  %v117_v6 = vld [vmem:[%s455_s3 + $0x8] sm:$0xff]  ;;  %337 = vmatprep.mubr.msk.f32.mxu1 %vm366_vm0, %v367_v3  ;;  %v118_v10 = vld [vmem:[%s455_s3 + $0x10] sm:$0xff]  ;;  %vm368_vm4 = vmmov 1   ;;  %vm127_vm6 = vcmask 244736   ;;  %vm219_vm7 = vcmask 1041408  }
   0x3   :  { %v351_v7 = vpack.c.bf16 %v117_v6, %v116_v5  ;;  %v26_v9 = vld [vmem:[%s456_s0] sm:$0xff]  ;;  %v119_v11 = vld [vmem:[%s455_s3 + $0x18] sm:$0x3f]  ;;  %vm355_vm5 = vmpackc.low %vm131_vm3, %vm368_vm4  ;;  %vm215_vm9 = vcmask 80896   ;;  %vm293_vm10 = vcmask 15360  }
   0x4   :  { %349 = vmatpush3.bf16.msra.mxu0 %v348_v4  ;;  %v354_v12 = vpack.c.bf16 %v119_v11, %v118_v10  ;;  %v299_v13 = vld [vmem:[%s457_s2] ss:$0 sm:$0xff]  ;;  %vm359_vm8 = vmpackc.low %vm219_vm7, %vm368_vm4  ;;  %v207_v19 = vld [vmem:[%s458_s5 + $0x8] sm:$0x3] }
   0x5   :  { %324 = vmatprep.subr.mxu0 %v367_v3  ;;  %352 = vmatpush3.bf16.msra.mxu1 %v351_v7  ;;  %v206_v18 = vld [vmem:[%s458_s5] sm:$0xff] }
   0x6   :  { %353 = vmatprep.subr.bf16.mxu1 %v365_v0  ;;  %v358_v20 = vpack.c.bf16 %v207_v19, %v206_v18  ;;  %v302_v21 = vld [vmem:[%s459_s4] ss:$0 sm:$0xff] }
   0x7   :  { %v305_v26 = vld [vmem:[%s460_s6] ss:$0 sm:$0xff] }
   0x8   :  { %325 = vmatpush3.msk.msra.mxu0 %vm41_vm1, %v29_v8 }
   0x9   :  { %327 = vmatmul.mubr.msk.f32.vlgmr.msra.gmra.mrb[0].mxu0 %vm37_vm2, %v26_v9  ;;  %357 = vmatprep.subr.bf16.mxu0 %v365_v0 }
   0xa   :  { %344 = vmatprep.mubr.msk.f32.mxu0 %vm366_vm0, %v367_v3  ;;  %356 = vmatpush3.bf16.msk.msra.mxu1 %vm355_vm5, %v354_v12 }
   0xb   :  { %360 = vmatpush3.bf16.msk.msra.mxu0 %vm359_vm8, %v358_v20 }
  0xdc   :  { %v111_v14 = vpop.f32.mrb[0].mxu0 }
  0xdd   :  { %v112_v15 = vadd.f32 %v299_v13, %v111_v14  ;;  %v328_v16 = vpop.f32.mrb[1].mxu0 }
  0xdf   :  { %v115_v17 = vmax.f32 %v112_v15, 0.0 }
  0xe1   :  { %338 = vmatmul.mubr.msk.f32.vlgmr.msra.gmra.mrb[0].mxu1 %vm127_vm6, %v115_v17 }
 0x1b4   :  { %v201_v22 = vpop.f32.mrb[0].mxu1 }
 0x1b5   :  { %v202_v23 = vadd.f32 %v302_v21, %v201_v22  ;;  %v339_v24 = vpop.f32.mrb[1].mxu1 }
 0x1b7   :  { %v205_v25 = vmax.f32 %v202_v23, 0.0 }
 0x1b9   :  { %345 = vmatmul.mubr.msk.f32.vlgmr.msra.gmra.mrb[2].mxu0 %vm215_vm9, %v205_v25 }
 0x28c   :  { %v289_v27 = vpop.f32.mrb[2].mxu0 }
 0x28d   :  { %v290_v28 = vadd.f32 %v305_v26, %v289_v27  ;;  %v346_v29 = vpop.f32.mrb[3].mxu0 }
 0x28f   :  { %294 = vst.msk [vmem:[%s461_s7] sm:$0xff] %vm293_vm10, %v290_v28 }

</bundles_post_ra>
